<compile_context>
chip_gen: v7x
topology: tpu7x:2x2x1
jax: 0.10.0
libtpu: 0.0.40
codegen_flags: <defaults>
</compile_context>

<pallas_src>
import functools
import math

import jax
import jax.numpy as jnp
from jax.experimental import pallas as pl
from jax.experimental.pallas import tpu as pltpu


# ---------------------------------------------------------------------------
# Kernel bodies
# ---------------------------------------------------------------------------
def _ln_core(x32, g, b, *, eps, h, k):
    """g * (x - mean) / (std_unbiased + eps) + b per logical row of h features.

    x32: (rt, k*h) f32 tile; each physical row packs k logical rows along the
    lane axis (segment j occupies lanes [j*h, (j+1)*h)). g/b are (1, k*h),
    already tiled k times in the wrapper. Two-pass statistics (exact match to
    torch's mean/std up to reduction order); torch.std default is unbiased
    (N-1). pl.reciprocal only touches the tiny (rt, 1) stats vectors.
    """
    inv_n = 1.0 / float(h)
    inv_nm1 = 1.0 / (float(h) - 1.0)

    if k == 1:
        mean = jnp.sum(x32, axis=-1, keepdims=True) * inv_n
        d = x32 - mean
        var = jnp.sum(d * d, axis=-1, keepdims=True) * inv_nm1
        inv = pl.reciprocal(jnp.sqrt(var) + eps, approx=False)
        # Keep the affine + output cast a single fused elementwise chain.
        return g * (d * inv) + b

    # Packed path: per-segment masked reductions keep the tile lane-dense
    # (last dim = k*h, a multiple of 128) without an in-kernel reshape.
    lane = jax.lax.broadcasted_iota(jnp.int32, x32.shape, x32.ndim - 1)
    masks = []
    for j in range(k):
        if j == 0:
            m = lane < h
        elif j == k - 1:
            m = lane >= (k - 1) * h
        else:
            m = jnp.logical_and(lane >= j * h, lane < (j + 1) * h)
        masks.append(m)

    # Pass 1: per-segment means, broadcast back with a (k-1)-deep select chain.
    means = [
        jnp.sum(jnp.where(masks[j], x32, 0.0), axis=-1, keepdims=True) * inv_n
        for j in range(k)
    ]
    mean_full = means[-1]
    for j in range(k - 2, -1, -1):
        mean_full = jnp.where(masks[j], means[j], mean_full)

    # Pass 2: centered sum of squares per segment (computed once, masked k times).
    d = x32 - mean_full
    dd = d * d
    invs = []
    for j in range(k):
        ss = jnp.sum(jnp.where(masks[j], dd, 0.0), axis=-1, keepdims=True)
        invs.append(pl.reciprocal(jnp.sqrt(ss * inv_nm1) + eps, approx=False))
    inv_full = invs[-1]
    for j in range(k - 2, -1, -1):
        inv_full = jnp.where(masks[j], invs[j], inv_full)

    return g * (d * inv_full) + b


def _layernorm_kernel(x_ref, g_ref, b_ref, o_ref, *, eps, h, k):
    y = _ln_core(x_ref[...].astype(jnp.float32), g_ref[...], b_ref[...],
                 eps=eps, h=h, k=k)
    o_ref[...] = y.astype(o_ref.dtype)


def _add_layernorm_kernel(x_ref, r_ref, g_ref, b_ref, o_ref, *, eps, h, k):
    s = x_ref[...].astype(jnp.float32) + r_ref[...].astype(jnp.float32)
    y = _ln_core(s, g_ref[...], b_ref[...], eps=eps, h=h, k=k)
    o_ref[...] = y.astype(o_ref.dtype)


# ---------------------------------------------------------------------------
# Tiling / packing heuristics
# ---------------------------------------------------------------------------
def _vmem_capacity_bytes():
    """Per-core VMEM capacity; conservative 64 MiB fallback (safe on all gens)."""
    try:
        return int(pltpu.get_tpu_info().vmem_capacity_bytes)
    except Exception:
        return 64 << 20


def _packing_factor(R, H):
    """Logical rows packed per physical row so the lane axis is 128-dense."""
    if H % 128 == 0:
        return 1
    k = 128 // math.gcd(H, 128)
    # Only pack when it divides the row count and the per-segment mask work
    # stays cheap; otherwise fall back to masked partial stores (correct).
    if 2 <= k <= 8 and R % k == 0:
        return k
    return 1


def _pick_row_tile(R, W, dtype, n_streams):
    """Rows per grid step + vmem_limit_bytes, derived from the chip's VMEM.

    Budget = (capacity - 16 MiB headroom, clamped at 100 MiB) * 0.85, covering
    the double-buffered row streams plus a generous count of f32 temporaries
    (x32/r32, centered diff, squared diff, masks/iota). No hard row cap: bigger
    streaming tiles amortize the ~0.35 us per-step overhead (85-86% of HBM
    roofline measured on v6e). If >= 2 aligned tiles of rows exist, force >= 2
    balanced grid steps so a megacore (v7x, 2 TCs) splits the 'parallel' axis.
    """
    itemsize = jnp.dtype(dtype).itemsize
    align = 16 if itemsize == 2 else 8            # sublane packing per vreg
    n_tmp = n_streams + 3                         # f32 temporaries per element (generous)
    per_row = W * (2 * n_streams * itemsize + n_tmp * 4)

    cap = _vmem_capacity_bytes()
    vmem_limit = int(min(cap - (16 << 20), 100 << 20))
    tile_budget = int(vmem_limit * 0.85)

    rt_max = max(align, (tile_budget // per_row) // align * align)
    steps = -(-R // rt_max)
    if R >= 2 * align:
        steps = max(steps, 2)                     # both TCs on v7x megacore
    rt = -(-R // steps)
    rt = -(-rt // align) * align                  # sublane-aligned tiles
    if rt >= R:
        rt = R                                    # full-extent block: always legal
    return int(rt), vmem_limit


# ---------------------------------------------------------------------------
# Public wrapper
# ---------------------------------------------------------------------------
def layer_norm(x, g, b, eps=1e-5, *, residual=None, row_tile=None):
    """LayerNorm over the last axis: g * (x - mean) / (std_unbiased + eps) + b.

    If `residual` is given, computes layer_norm(x + residual) fused in a single
    HBM pass (used for norm2(t + dropout2(z)); dropout is identity at inference).
    """
    orig_shape = x.shape
    H = int(orig_shape[-1])
    if H < 2:
        raise ValueError("layer_norm needs >= 2 features (unbiased std divides by N-1).")

    x2 = x.reshape(-1, H)
    R = x2.shape[0]

    # Lane-dense packing: k logical rows per physical row (metadata-only reshape).
    k = _packing_factor(R, H)
    W = k * H
    Rp = R // k
    xp = x2.reshape(Rp, W)

    n_streams = 2 if residual is None else 3      # row-tiled arrays moving through VMEM
    rt_auto, vmem_limit = _pick_row_tile(Rp, W, x.dtype, n_streams)
    rt = int(row_tile) if row_tile is not None else rt_auto

    # Params cast/tiled once on the host; constant index_map keeps them VMEM
    # resident for the whole grid.
    g32 = g.reshape(1, H).astype(jnp.float32)
    b32 = b.reshape(1, H).astype(jnp.float32)
    if k > 1:
        g32 = jnp.tile(g32, (1, k))
        b32 = jnp.tile(b32, (1, k))

    row_spec = pl.BlockSpec((rt, W), lambda i: (i, 0))
    par_spec = pl.BlockSpec((1, W), lambda i: (0, 0))

    if residual is None:
        kernel = functools.partial(_layernorm_kernel, eps=float(eps), h=H, k=k)
        in_specs = [row_spec, par_spec, par_spec]
        args = (xp, g32, b32)
    else:
        assert residual.shape == x.shape, "residual must match x shape"
        rp = residual.reshape(Rp, W)
        kernel = functools.partial(_add_layernorm_kernel, eps=float(eps), h=H, k=k)
        in_specs = [row_spec, row_spec, par_spec, par_spec]
        args = (xp, rp, g32, b32)

    out = pl.pallas_call(
        kernel,
        out_shape=jax.ShapeDtypeStruct((Rp, W), x.dtype),
        grid_spec=pltpu.PrefetchScalarGridSpec(
            num_scalar_prefetch=0,
            grid=(pl.cdiv(Rp, rt),),              # ragged tail block clipped on writeback
            in_specs=in_specs,
            out_specs=row_spec,
        ),
        compiler_params=pltpu.CompilerParams(
            dimension_semantics=("parallel",),    # shards rows across v7x's 2 TCs
            vmem_limit_bytes=int(vmem_limit),
        ),
    )(*args)

    return out.reshape(orig_shape)


def encoder_reduction_layer(x, mask, *, attn_fn, feed_forward_fn, g1, b1, g2, b2, eps=1e-5):
    """Forward of EncoderReductionLayer (inference mode: dropout = identity)."""
    B, S, D = x.shape
    x = x.reshape(B, S // 2, 2 * D)               # "reduce the output size by 2"
    # TODO(synk): `attn` is a constructor-injected nn.Module with no definition
    # in the spec; the caller supplies it (runs as plain JAX here).
    a = attn_fn(x, x, x, mask)
    t = layer_norm(a, g1, b1, eps)                # norm1(dropout1(a))
    # TODO(synk): `feed_forward` is likewise an injected nn.Module supplied by the caller.
    z = feed_forward_fn(t)
    y = layer_norm(t, g2, b2, eps, residual=z)    # norm2(t + dropout2(z)), fused add+norm
    return y


if __name__ == "__main__":
    key = jax.random.PRNGKey(0)
    batch, seq, hidden = 2, 8, 32                 # module-level x: (2, 8, 32)
    d_reduced = 2 * hidden                        # layer_size seen by norm1/norm2 after the view

    k1, k2 = jax.random.split(key, 2)
    # `a` stands in for the attention output, `z` for the feed-forward output,
    # both at the reduced shape (B, S//2, 2*D) the norms actually operate on.
    a = jax.random.normal(k1, (batch, seq // 2, d_reduced), dtype=jnp.float32)
    z = jax.random.normal(k2, (batch, seq // 2, d_reduced), dtype=jnp.float32)

    g1 = jnp.ones((d_reduced,), jnp.float32)
    b1 = jnp.zeros((d_reduced,), jnp.float32)
    g2 = 1.0 + 0.01 * jnp.arange(d_reduced, dtype=jnp.float32)
    b2 = 0.01 * jnp.arange(d_reduced, dtype=jnp.float32)

    eps = 1e-5

    def ref_norm(v, g, b):
        mean = jnp.mean(v, axis=-1, keepdims=True)
        std = jnp.std(v, axis=-1, keepdims=True, ddof=1)   # unbiased, like torch.std
        return g * ((v - mean) / (std + eps)) + b

    # norm1(dropout1(a)) — dropout identity at inference. H=64 → packed path (k=2).
    t = jax.block_until_ready(layer_norm(a, g1, b1, eps))
    assert jnp.allclose(t, ref_norm(a, g1, b1), atol=3e-5, rtol=3e-5), "norm1 mismatch"

    # norm2(t + dropout2(z)) — residual add fused into the norm kernel.
    y = jax.block_until_ready(layer_norm(t, g2, b2, eps, residual=z))
    assert jnp.allclose(y, ref_norm(t + z, g2, b2), atol=3e-5, rtol=3e-5), "norm2 mismatch"

    # Extra coverage: unpacked path (H multiple of 128, k=1).
    xk1 = jax.random.normal(jax.random.PRNGKey(1), (2, 4, 128), dtype=jnp.float32)
    gk1 = 1.0 + 0.02 * jnp.arange(128, dtype=jnp.float32)
    bk1 = 0.05 * jnp.arange(128, dtype=jnp.float32)
    yk1 = jax.block_until_ready(layer_norm(xk1, gk1, bk1, eps))
    assert jnp.allclose(yk1, ref_norm(xk1, gk1, bk1), atol=3e-5, rtol=3e-5), "k=1 path mismatch"

    # Extra coverage: multi-step grid (megacore split) with a ragged tail + fused residual.
    xr = jax.random.normal(jax.random.PRNGKey(2), (3, 14, 64), dtype=jnp.float32)
    zr = jax.random.normal(jax.random.PRNGKey(3), (3, 14, 64), dtype=jnp.float32)
    gr = jnp.ones((64,), jnp.float32)
    br = jnp.zeros((64,), jnp.float32)
    yr = jax.block_until_ready(layer_norm(xr, gr, br, eps, residual=zr))
    assert jnp.allclose(yr, ref_norm(xr + zr, gr, br), atol=3e-5, rtol=3e-5), "ragged/multi-tile mismatch"

    print("KERNEL_OK")
</pallas_src>

<mosaic_0001>
module attributes {stable_mosaic.version = 11 : i64} {
  func.func @_layernorm_kernel(%arg0: i32, %arg1: memref<4x128xf32, #tpu.memory_space<vmem>>, %arg2: memref<1x128xf32, #tpu.memory_space<vmem>>, %arg3: memref<1x128xf32, #tpu.memory_space<vmem>>, %arg4: memref<4x128xf32, #tpu.memory_space<vmem>>) attributes {dimension_semantics = [#tpu.dimension_semantics<parallel>], iteration_bounds = array<i64: 1>, scalar_prefetch = 0 : i64, scratch_operands = 0 : i64, tpu.core_type = #tpu.core_type<tc>, window_params = [{transform_indices = @transform_0, window_bounds = array<i64: 4, 128>}, {pipeline_mode = #tpu.pipeline_mode<synchronous>, transform_indices = @transform_1, window_bounds = array<i64: 1, 128>}, {pipeline_mode = #tpu.pipeline_mode<synchronous>, transform_indices = @transform_2, window_bounds = array<i64: 1, 128>}, {transform_indices = @transform_3, window_bounds = array<i64: 4, 128>}]} {
    %c0 = arith.constant 0 : index
    %c0_0 = arith.constant 0 : index
    %0 = vector.load %arg1[%c0, %c0_0] : memref<4x128xf32, #tpu.memory_space<vmem>>, vector<4x128xf32>
    %c0_1 = arith.constant 0 : index
    %c0_2 = arith.constant 0 : index
    %1 = vector.load %arg2[%c0_1, %c0_2] : memref<1x128xf32, #tpu.memory_space<vmem>>, vector<1x128xf32>
    %c0_3 = arith.constant 0 : index
    %c0_4 = arith.constant 0 : index
    %2 = vector.load %arg3[%c0_3, %c0_4] : memref<1x128xf32, #tpu.memory_space<vmem>>, vector<1x128xf32>
    %3 = tpu.iota {dimensions = array<i32: 1>} : vector<4x128xi32>
    %c64_i32 = arith.constant 64 : i32
    %4 = vector.broadcast %c64_i32 : i32 to vector<4x128xi32>
    %5 = arith.cmpi slt, %3, %4 : vector<4x128xi32>
    %c64_i32_5 = arith.constant 64 : i32
    %6 = vector.broadcast %c64_i32_5 : i32 to vector<4x128xi32>
    %7 = arith.cmpi sge, %3, %6 : vector<4x128xi32>
    %cst = arith.constant 0.000000e+00 : f32
    %8 = vector.broadcast %cst : f32 to vector<4x128xf32>
    %9 = arith.select %5, %0, %8 : vector<4x128xi1>, vector<4x128xf32>
    %cst_6 = arith.constant dense<0.000000e+00> : vector<4xf32>
    %10 = vector.multi_reduction <add>, %9, %cst_6 [1] : vector<4x128xf32> to vector<4xf32>
    %11 = vector.shape_cast %10 : vector<4xf32> to vector<4x1xf32>
    %cst_7 = arith.constant 1.562500e-02 : f32
    %12 = vector.broadcast %cst_7 : f32 to vector<4x1xf32>
    %13 = arith.mulf %11, %12 : vector<4x1xf32>
    %cst_8 = arith.constant 0.000000e+00 : f32
    %14 = vector.broadcast %cst_8 : f32 to vector<4x128xf32>
    %15 = arith.select %7, %0, %14 : vector<4x128xi1>, vector<4x128xf32>
    %cst_9 = arith.constant dense<0.000000e+00> : vector<4xf32>
    %16 = vector.multi_reduction <add>, %15, %cst_9 [1] : vector<4x128xf32> to vector<4xf32>
    %17 = vector.shape_cast %16 : vector<4xf32> to vector<4x1xf32>
    %cst_10 = arith.constant 1.562500e-02 : f32
    %18 = vector.broadcast %cst_10 : f32 to vector<4x1xf32>
    %19 = arith.mulf %17, %18 : vector<4x1xf32>
    %20 = vector.shape_cast %13 : vector<4x1xf32> to vector<4x1xf32>
    %21 = vector.broadcast %20 : vector<4x1xf32> to vector<4x128xf32>
    %22 = vector.shape_cast %19 : vector<4x1xf32> to vector<4x1xf32>
    %23 = vector.broadcast %22 : vector<4x1xf32> to vector<4x128xf32>
    %24 = arith.select %5, %21, %23 : vector<4x128xi1>, vector<4x128xf32>
    %25 = arith.subf %0, %24 : vector<4x128xf32>
    %26 = arith.mulf %25, %25 : vector<4x128xf32>
    %cst_11 = arith.constant 0.000000e+00 : f32
    %27 = vector.broadcast %cst_11 : f32 to vector<4x128xf32>
    %28 = arith.select %5, %26, %27 : vector<4x128xi1>, vector<4x128xf32>
    %cst_12 = arith.constant dense<0.000000e+00> : vector<4xf32>
    %29 = vector.multi_reduction <add>, %28, %cst_12 [1] : vector<4x128xf32> to vector<4xf32>
    %30 = vector.shape_cast %29 : vector<4xf32> to vector<4x1xf32>
    %cst_13 = arith.constant 0.0158730168 : f32
    %31 = vector.broadcast %cst_13 : f32 to vector<4x1xf32>
    %32 = arith.mulf %30, %31 : vector<4x1xf32>
    %33 = math.sqrt %32 : vector<4x1xf32>
    %cst_14 = arith.constant 9.99999974E-6 : f32
    %34 = vector.broadcast %cst_14 : f32 to vector<4x1xf32>
    %35 = arith.addf %33, %34 : vector<4x1xf32>
    %36 = tpu.reciprocal %35 : vector<4x1xf32> -> vector<4x1xf32>
    %cst_15 = arith.constant 0.000000e+00 : f32
    %37 = vector.broadcast %cst_15 : f32 to vector<4x128xf32>
    %38 = arith.select %7, %26, %37 : vector<4x128xi1>, vector<4x128xf32>
    %cst_16 = arith.constant dense<0.000000e+00> : vector<4xf32>
    %39 = vector.multi_reduction <add>, %38, %cst_16 [1] : vector<4x128xf32> to vector<4xf32>
    %40 = vector.shape_cast %39 : vector<4xf32> to vector<4x1xf32>
    %cst_17 = arith.constant 0.0158730168 : f32
    %41 = vector.broadcast %cst_17 : f32 to vector<4x1xf32>
    %42 = arith.mulf %40, %41 : vector<4x1xf32>
    %43 = math.sqrt %42 : vector<4x1xf32>
    %cst_18 = arith.constant 9.99999974E-6 : f32
    %44 = vector.broadcast %cst_18 : f32 to vector<4x1xf32>
    %45 = arith.addf %43, %44 : vector<4x1xf32>
    %46 = tpu.reciprocal %45 : vector<4x1xf32> -> vector<4x1xf32>
    %47 = vector.shape_cast %36 : vector<4x1xf32> to vector<4x1xf32>
    %48 = vector.broadcast %47 : vector<4x1xf32> to vector<4x128xf32>
    %49 = vector.shape_cast %46 : vector<4x1xf32> to vector<4x1xf32>
    %50 = vector.broadcast %49 : vector<4x1xf32> to vector<4x128xf32>
    %51 = arith.select %5, %48, %50 : vector<4x128xi1>, vector<4x128xf32>
    %52 = arith.mulf %25, %51 : vector<4x128xf32>
    %53 = vector.broadcast %1 : vector<1x128xf32> to vector<4x128xf32>
    %54 = arith.mulf %53, %52 : vector<4x128xf32>
    %55 = vector.broadcast %2 : vector<1x128xf32> to vector<4x128xf32>
    %56 = arith.addf %54, %55 : vector<4x128xf32>
    %c0_19 = arith.constant 0 : index
    %c0_20 = arith.constant 0 : index
    %57 = vector.load %arg4[%c0_19, %c0_20] : memref<4x128xf32, #tpu.memory_space<vmem>>, vector<4x128xf32>
    tpu.vector_store %arg4[%c0_19, %c0_20], %56 {strides = array<i32>} : memref<4x128xf32, #tpu.memory_space<vmem>>, vector<4x128xf32>,
    return
  }
  func.func @transform_0(%arg0: i32) -> (i32, i32) {
    %c0_i32 = arith.constant 0 : i32
    %c0_i32_0 = arith.constant 0 : i32
    return %arg0, %c0_i32 : i32, i32
  }
  func.func @transform_1(%arg0: i32) -> (i32, i32) {
    %c0_i32 = arith.constant 0 : i32
    %c0_i32_0 = arith.constant 0 : i32
    %c0_i32_1 = arith.constant 0 : i32
    return %c0_i32, %c0_i32_0 : i32, i32
  }
  func.func @transform_2(%arg0: i32) -> (i32, i32) {
    %c0_i32 = arith.constant 0 : i32
    %c0_i32_0 = arith.constant 0 : i32
    %c0_i32_1 = arith.constant 0 : i32
    return %c0_i32, %c0_i32_0 : i32, i32
  }
  func.func @transform_3(%arg0: i32) -> (i32, i32) {
    %c0_i32 = arith.constant 0 : i32
    %c0_i32_0 = arith.constant 0 : i32
    return %arg0, %c0_i32 : i32, i32
  }
}

</mosaic_0001>

<bundles_post_ra>
// kernel: tpu_custom_call.1
= control target key start
LH: loop header
LB: loop body
LE: loop exit
PB: predicated region body
PF: predicated region fallthrough
CT: control target
= control target key end

     0   :  { %8 = vsyncpa [#allocation3], 0  ;;  %s230_s0 = inlined_call_operand.hbm [shape: f32[4,128], index: 0, kind: input, shape index: {}]   ;;  %s231_s1 = inlined_call_operand.vmem [shape: f32[1,128], index: 1, kind: input, shape index: {}]   ;;  %s232_s2 = inlined_call_operand.vmem [shape: f32[1,128], index: 2, kind: input, shape index: {}]   ;;  %s233_s3 = inlined_call_operand.hbm [shape: f32[4,128], index: 3, kind: output, shape index: {}]  }
   0x1   :  { %9 = vsyncpa [#allocation4], 0  ;;  %s168_s12 = smov [#allocation2]   ;;  %s120_s16 = scalar_lea.hbm %s230_s0, 64 }
   0x2   :  { %s16_s13 = sshll.u32 %s168_s12, 4  ;;  %p121_p0 = scmp.ne.s32.totalorder %s230_s0, %s120_s16  ;;  %s17_s13 = int_to_ptr.vmem [resolvable:$true] %s16_s13 }
   0x3   :  { %p124_p1 = scmp.lt.u32.totalorder %s120_s16, %s230_s0 }
   0x5   :  { %p126_p2 = pnand %p124_p1, %p121_p0 }
   0x7   :  { %129 = shalt.err (!%p126_p2)
}
   0x8   :  { %s130_s21 = scalar_lea.vmem %s17_s13, 64  ;;  %p135_p4 = scmp.lt.s32.totalorder %s17_s13, %s17_s13 }
   0x9   :  { %p131_p3 = scmp.ne.s32.totalorder %s17_s13, %s130_s21  ;;  %p136_p5 = scmp.lt.s32.totalorder %s130_s21, %s130_s21 }
   0xb   :  { %p137_p6 = por %p136_p5, %p135_p4 }
   0xd   :  { %p138_p7 = pnand %p137_p6, %p131_p3 }
   0xf   :  { %141 = shalt.err (!%p138_p7)
}
  0x10   :  { %19 = dma.hbm_to_vmem [thread:$0]  %s230_s0, 64, %s17_s13, [#allocation3]  }
  0x11   :  { %164 = dma.done.wait [#allocation3], 64  }
  0x12   :  { %165 = vsyncadd [#allocation3], 4294967232  ;;  %v30_v0 = vlaneseq  ;;  %vm35_vm2 = vcmask 1043456   ;;  %v27_v2 = vld [vmem:[#allocation2] sm:$0xf]  ;;  %s169_s27 = smov [#allocation5]  }
  0x13   :  { %v108_v36 = vld [vmem:[%s231_s1] ss:$0 sm:$0xff]  ;;  %s99_s28 = sshll.u32 %s169_s27, 4  ;;  %s100_s28 = int_to_ptr.vmem [resolvable:$true] %s99_s28 }
  0x14   :  { %v31_v1 = vand.u32 127, %v30_v0  ;;  %v109_v39 = vld [vmem:[%s232_s2] ss:$0 sm:$0xff]  ;;  %s142_s29 = scalar_lea.vmem %s100_s28, 64  ;;  %p147_p9 = scmp.lt.s32.totalorder %s100_s28, %s100_s28 }
  0x15   :  { %p143_p8 = scmp.ne.s32.totalorder %s100_s28, %s142_s29  ;;  %p148_p10 = scmp.lt.s32.totalorder %s142_s29, %s142_s29 }
  0x16   :  { %vm32_vm0 = vcmp.lt.s32.totalorder %v31_v1, 64  ;;  %vm33_vm1 = vcmp.ge.s32.totalorder %v31_v1, 64 }
  0x17   :  { %v34_v3 = vsel %vm32_vm0, %v27_v2, 0.0  ;;  %v40_v4 = vsel %vm33_vm1, %v27_v2, 0.0  ;;  %p149_p11 = por %p148_p10, %p147_p9 }
  0x18   :  { %v36_v5 = vsel %vm35_vm2, %v34_v3, 0.0  ;;  %v41_v6 = vsel %vm35_vm2, %v40_v4, 0.0 }
  0x19   :  { %37 = vadd.xlane.f32.xlu0 %v36_v5  ;;  %p150_p12 = pnand %p149_p11, %p143_p8 }
  0x1d   :  { %42 = vadd.xlane.f32.xlu0 %v41_v6 }
  0xa6   :  { %v38_v7 = vpop.xlane.xlu0 %37 }
  0xa7   :  { %v39_v9 = vmul.f32 0.015625, %v38_v7 }
  0xaa   :  { %v43_v8 = vpop.xlane.xlu0 %42 }
  0xab   :  { %v44_v10 = vmul.f32 0.015625, %v43_v8 }
  0xad   :  { %v45_v11 = vsel %vm32_vm0, %v39_v9, %v44_v10 }
  0xae   :  { %v46_v12 = vsub.f32 %v27_v2, %v45_v11 }
  0xb0   :  { %v47_v13 = vmul.f32 %v46_v12, %v46_v12 }
  0xb2   :  { %v48_v14 = vsel %vm32_vm0, %v47_v13, 0.0  ;;  %v62_v16 = vsel %vm33_vm1, %v47_v13, 0.0 }
  0xb3   :  { %v49_v15 = vsel %vm35_vm2, %v48_v14, 0.0  ;;  %v63_v17 = vsel %vm35_vm2, %v62_v16, 0.0 }
  0xb4   :  { %50 = vadd.xlane.f32.xlu1 %v49_v15 }
  0xb8   :  { %64 = vadd.xlane.f32.xlu1 %v63_v17 }
 0x141   :  { %v51_v18 = vpop.xlane.xlu1 %50 }
 0x142   :  { %v52_v19 = vmul.f32 0.015873017, %v51_v18 }
 0x144   :  { %112 = vrsqrt.f32 %v52_v19  ;;  %vm55_vm3 = vcmp.eq.f32.partialorder %v52_v19, inf  ;;  %v58_v24 = vand.u32 2147483648, %v52_v19  ;;  %vm57_vm4 = vcmp.eq.f32.partialorder %v52_v19, 0.0 }
 0x145   :  { %v65_v20 = vpop.xlane.xlu1 %64 }
 0x146   :  { %v66_v21 = vmul.f32 0.015873017, %v65_v20 }
 0x148   :  { %114 = vrsqrt.f32 %v66_v21  ;;  %vm69_vm5 = vcmp.eq.f32.partialorder %v66_v21, inf  ;;  %v72_v30 = vand.u32 2147483648, %v66_v21  ;;  %vm71_vm6 = vcmp.eq.f32.partialorder %v66_v21, 0.0 }
 0x14e   :  { %v113_v22 = vpop.eup %112 }
 0x14f   :  { %v54_v23 = vmul.f32 %v113_v22, %v52_v19 }
 0x151   :  { %v56_v25 = vsel %vm55_vm3, %v52_v19, %v54_v23 }
 0x152   :  { %v115_v26 = vpop.eup %114  ;;  %v59_v27 = vsel %vm57_vm4, %v58_v24, %v56_v25 }
 0x153   :  { %v68_v28 = vmul.f32 %v115_v26, %v66_v21  ;;  %v60_v29 = vadd.f32 1e-05, %v59_v27 }
 0x155   :  { %v70_v31 = vsel %vm69_vm5, %v66_v21, %v68_v28  ;;  %116 = vrcp.f32 %v60_v29 }
 0x156   :  { %v73_v32 = vsel %vm71_vm6, %v72_v30, %v70_v31 }
 0x157   :  { %v74_v33 = vadd.f32 1e-05, %v73_v32 }
 0x159   :  { %118 = vrcp.f32 %v74_v33 }
 0x15f   :  { %v117_v34 = vpop.eup %116 }
 0x163   :  { %v119_v35 = vpop.eup %118 }
 0x164   :  { %v76_v37 = vsel %vm32_vm0, %v117_v34, %v119_v35 }
 0x165   :  { %v77_v38 = vmul.f32 %v76_v37, %v46_v12 }
 0x167   :  { %v84_v40 = vmul.f32 %v108_v36, %v77_v38 }
 0x169   :  { %v91_v41 = vadd.f32 %v109_v39, %v84_v40 }
 0x16b   :  { %92 = vst [vmem:[#allocation5] sm:$0xf] %v91_v41 }
 0x16c   :  { %153 = shalt.err (!%p150_p12)
}
 0x16d   :  { %s154_s4 = scalar_lea.hbm %s233_s3, 64 }
 0x16e   :  { %p155_p13 = scmp.ne.s32.totalorder %s233_s3, %s154_s4  ;;  %p158_p0 = scmp.lt.u32.totalorder %s154_s4, %s233_s3 }
 0x170   :  { %p160_p1 = pnand %p158_p0, %p155_p13 }
 0x172   :  { %163 = shalt.err (!%p160_p1)
}
 0x173   :  { %102 = dma.vmem_to_hbm [thread:$0]  %s100_s28, 64, %s233_s3, [#allocation4]  }
 0x174   :  { %166 = dma.done.wait [#allocation4], 64  }
 0x175   :  { %167 = vsyncadd [#allocation4], 4294967232 }
 0x176   :  { %106 = vsyncpa [#allocation3], 1 }
 0x177   :  { %107 = vsyncpa [#allocation4], 1 }

</bundles_post_ra>
